<compile_context>
chip_gen: v6e
topology: v6e:2x2x1
jax: 0.10.0
libtpu: 0.0.40
codegen_flags: <defaults>
</compile_context>

<pallas_src>
import functools

import jax
import jax.numpy as jnp
from jax import lax
from jax.experimental import pallas as pl
from jax.experimental.pallas import tpu as pltpu

_HIDDEN = 64               # per-branch hidden width (PyTorch module uses 64)
_FUSED_H = 2 * _HIDDEN     # actor + critic hidden packed side by side -> 128 lanes
_OUT_LANES = 128           # lane-dense packed output slab width


def _round_up(x, m):
    return (x + m - 1) // m * m


def _fused_kernel(action_dim,
                  state_ref, w1_ref, b1_ref, w2_ref, b2_ref, w3_ref, b3_ref,
                  out_ref):
    """One batch tile of the fused actor+critic MLP.

    state_ref : [TILE_B, S]   f32
    w*_ref    : packed bf16 weights (actor|critic fused / block-diagonal)
    b*_ref    : [1, 128]      f32 biases
    out_ref   : [TILE_B, 128] f32 slab: cols [0, A) = softmax probs,
                col A = state value, remaining lanes = 0.
    """
    x = state_ref[...].astype(jnp.bfloat16)

    # layer 1: [TILE_B, S] @ [S, 128]  -> (actor hidden | critic hidden)
    h = jnp.tanh(
        jnp.dot(x, w1_ref[...], preferred_element_type=jnp.float32) + b1_ref[...]
    )
    # layer 2: block-diagonal [128, 128] keeps actor/critic independent
    h = jnp.tanh(
        jnp.dot(h.astype(jnp.bfloat16), w2_ref[...],
                preferred_element_type=jnp.float32) + b2_ref[...]
    )
    # layer 3: [128, 128]; cols [0, A) = actor logits, col A = critic value,
    # remaining lanes are exact-zero padding.
    z = (
        jnp.dot(h.astype(jnp.bfloat16), w3_ref[...],
                preferred_element_type=jnp.float32) + b3_ref[...]
    )

    col = lax.broadcasted_iota(jnp.int32, z.shape, 1)
    is_logit = col < action_dim
    is_value = col == action_dim

    # numerically-stable masked softmax over the first `action_dim` lanes
    masked = jnp.where(is_logit, z, jnp.float32(-1e30))
    m = jnp.max(masked, axis=-1, keepdims=True)
    e = jnp.exp(masked - m)                        # exactly 0 on masked lanes
    denom = jnp.sum(e, axis=-1, keepdims=True)
    probs = e * pl.reciprocal(denom, approx=True)  # EUP vrcp slot

    out_ref[...] = jnp.where(is_value, z, probs)


@functools.partial(jax.jit, static_argnames=("action_dim",))
def actor_critic_forward(state, packed, action_dim):
    """state: [B, S] f32 -> (action_probs [B, A] f32, state_values [B, 1] f32)."""
    B, S = state.shape

    # Batch tile: multiple of 8 (f32 sublane); 512 rows keeps the streamed
    # tile + double buffers + ~65 KB of resident weights tiny even under
    # v7x's 64 MiB VMEM while staying near the HBM-roofline tile size.
    tile_b = min(512, _round_up(max(B, 1), 8))
    b_pad = _round_up(B, tile_b)
    if b_pad != B:
        state = jnp.pad(state, ((0, b_pad - B), (0, 0)))
    grid = (b_pad // tile_b,)

    kernel = functools.partial(_fused_kernel, action_dim)

    flops = 2 * b_pad * (S * _FUSED_H + _FUSED_H * _FUSED_H + _FUSED_H * _OUT_LANES)
    transcendentals = b_pad * (2 * _FUSED_H + action_dim + 1)
    bytes_accessed = (
        b_pad * S * 4                                   # state stream in
        + (packed["w1"].size + packed["w2"].size + packed["w3"].size) * 2
        + (packed["b1"].size + packed["b2"].size + packed["b3"].size) * 4
        + b_pad * _OUT_LANES * 4                        # output slab
    )

    const = lambda i: (0, 0)   # weights/biases: resident across grid steps
    out = pl.pallas_call(
        kernel,
        out_shape=jax.ShapeDtypeStruct((b_pad, _OUT_LANES), jnp.float32),
        grid=grid,
        in_specs=[
            pl.BlockSpec((tile_b, S), lambda i: (i, 0)),       # state stream
            pl.BlockSpec((S, _FUSED_H), const),                # w1
            pl.BlockSpec((1, _FUSED_H), const),                # b1
            pl.BlockSpec((_FUSED_H, _FUSED_H), const),         # w2
            pl.BlockSpec((1, _FUSED_H), const),                # b2
            pl.BlockSpec((_FUSED_H, _OUT_LANES), const),       # w3
            pl.BlockSpec((1, _OUT_LANES), const),              # b3
        ],
        out_specs=pl.BlockSpec((tile_b, _OUT_LANES), lambda i: (i, 0)),
        compiler_params=pltpu.CompilerParams(
            dimension_semantics=("parallel",),      # shard batch grid over TCs (v7x)
            vmem_limit_bytes=32 * 1024 * 1024,      # explicit, safe on v5e/v6e/v7x
        ),
        cost_estimate=pl.CostEstimate(
            flops=flops,
            transcendentals=transcendentals,
            bytes_accessed=bytes_accessed,
        ),
    )(state, packed["w1"], packed["b1"], packed["w2"], packed["b2"],
      packed["w3"], packed["b3"])

    probs = out[:B, :action_dim]
    value = out[:B, action_dim:action_dim + 1]
    return probs, value


def init_params(key, state_dim, action_dim, hidden=_HIDDEN):
    """PyTorch-style uniform(-1/sqrt(fan_in), 1/sqrt(fan_in)) per-layer init.

    Weights stored as [in, out] (y = x @ W + b), biases as [out]."""
    def linear(k, fan_in, fan_out):
        kw, kb = jax.random.split(k)
        bound = 1.0 / jnp.sqrt(jnp.float32(fan_in))
        w = jax.random.uniform(kw, (fan_in, fan_out), jnp.float32, -bound, bound)
        b = jax.random.uniform(kb, (fan_out,), jnp.float32, -bound, bound)
        return w, b

    keys = jax.random.split(key, 6)
    aw1, ab1 = linear(keys[0], state_dim, hidden)
    aw2, ab2 = linear(keys[1], hidden, hidden)
    aw3, ab3 = linear(keys[2], hidden, action_dim)
    cw1, cb1 = linear(keys[3], state_dim, hidden)
    cw2, cb2 = linear(keys[4], hidden, hidden)
    cw3, cb3 = linear(keys[5], hidden, 1)
    return dict(
        aw1=aw1, ab1=ab1, aw2=aw2, ab2=ab2, aw3=aw3, ab3=ab3,
        cw1=cw1, cb1=cb1, cw2=cw2, cb2=cb2, cw3=cw3, cb3=cb3,
    )


def pack_params(p, action_dim, hidden=_HIDDEN):
    """Pack per-layer actor/critic weights into the fused bf16 layout."""
    w1 = jnp.concatenate([p["aw1"], p["cw1"]], axis=1)                   # [S, 128]
    b1 = jnp.concatenate([p["ab1"], p["cb1"]], axis=0)[None, :]          # [1, 128]

    w2 = jnp.zeros((2 * hidden, 2 * hidden), jnp.float32)                # block-diag
    w2 = w2.at[:hidden, :hidden].set(p["aw2"])
    w2 = w2.at[hidden:, hidden:].set(p["cw2"])
    b2 = jnp.concatenate([p["ab2"], p["cb2"]], axis=0)[None, :]          # [1, 128]

    w3 = jnp.zeros((2 * hidden, _OUT_LANES), jnp.float32)                # lane-padded
    w3 = w3.at[:hidden, :action_dim].set(p["aw3"])
    w3 = w3.at[hidden:, action_dim:action_dim + 1].set(p["cw3"])
    b3 = jnp.zeros((_OUT_LANES,), jnp.float32)
    b3 = b3.at[:action_dim].set(p["ab3"])
    b3 = b3.at[action_dim].set(p["cb3"][0])

    return dict(
        w1=w1.astype(jnp.bfloat16), b1=b1,
        w2=w2.astype(jnp.bfloat16), b2=b2,
        w3=w3.astype(jnp.bfloat16), b3=b3[None, :],
    )


def _reference(state, p):
    """Pure-JAX unfused reference, mirroring the kernel's bf16-in / f32-acc matmuls."""
    def lin(x, w, b):
        xb = x.astype(jnp.bfloat16).astype(jnp.float32)
        wb = w.astype(jnp.bfloat16).astype(jnp.float32)
        return xb @ wb + b

    h = jnp.tanh(lin(state, p["aw1"], p["ab1"]))
    h = jnp.tanh(lin(h, p["aw2"], p["ab2"]))
    probs = jax.nn.softmax(lin(h, p["aw3"], p["ab3"]), axis=-1)
    c = jnp.tanh(lin(state, p["cw1"], p["cb1"]))
    c = jnp.tanh(lin(c, p["cw2"], p["cb2"]))
    value = lin(c, p["cw3"], p["cb3"])
    return probs, value


if __name__ == "__main__":
    state_dim = 16
    action_dim = 4
    batch = 2

    key = jax.random.PRNGKey(0)
    k_params, k_state = jax.random.split(key)
    params = init_params(k_params, state_dim, action_dim)
    packed = pack_params(params, action_dim)
    state = jax.random.normal(k_state, (batch, state_dim), jnp.float32)

    probs, value = actor_critic_forward(state, packed, action_dim)
    jax.block_until_ready((probs, value))

    ref_probs, ref_value = _reference(state, params)
    assert probs.shape == (batch, action_dim)
    assert value.shape == (batch, 1)
    # probs tolerance covers the approx (EUP vrcp) reciprocal in the softmax
    assert jnp.allclose(probs, ref_probs, atol=5e-3, rtol=5e-3)
    assert jnp.allclose(value, ref_value, atol=1e-4, rtol=1e-4)
    assert jnp.allclose(jnp.sum(probs, axis=-1), 1.0, atol=5e-3)

    print("KERNEL_OK")
</pallas_src>

<mosaic_0001>
module attributes {stable_mosaic.version = 11 : i64} {
  func.func @_fused_kernel(%arg0: i32, %arg1: memref<8x16xf32, #tpu.memory_space<vmem>>, %arg2: memref<16x128xbf16, #tpu.memory_space<vmem>>, %arg3: memref<1x128xf32, #tpu.memory_space<vmem>>, %arg4: memref<128x128xbf16, #tpu.memory_space<vmem>>, %arg5: memref<1x128xf32, #tpu.memory_space<vmem>>, %arg6: memref<128x128xbf16, #tpu.memory_space<vmem>>, %arg7: memref<1x128xf32, #tpu.memory_space<vmem>>, %arg8: memref<8x128xf32, #tpu.memory_space<vmem>>) attributes {dimension_semantics = [#tpu.dimension_semantics<parallel>], iteration_bounds = array<i64: 1>, scalar_prefetch = 0 : i64, scratch_operands = 0 : i64, tpu.core_type = #tpu.core_type<tc>, window_params = [{transform_indices = @transform_0, window_bounds = array<i64: 8, 16>}, {pipeline_mode = #tpu.pipeline_mode<synchronous>, transform_indices = @transform_1, window_bounds = array<i64: 16, 128>}, {pipeline_mode = #tpu.pipeline_mode<synchronous>, transform_indices = @transform_2, window_bounds = array<i64: 1, 128>}, {pipeline_mode = #tpu.pipeline_mode<synchronous>, transform_indices = @transform_3, window_bounds = array<i64: 128, 128>}, {pipeline_mode = #tpu.pipeline_mode<synchronous>, transform_indices = @transform_4, window_bounds = array<i64: 1, 128>}, {pipeline_mode = #tpu.pipeline_mode<synchronous>, transform_indices = @transform_5, window_bounds = array<i64: 128, 128>}, {pipeline_mode = #tpu.pipeline_mode<synchronous>, transform_indices = @transform_6, window_bounds = array<i64: 1, 128>}, {transform_indices = @transform_7, window_bounds = array<i64: 8, 128>}]} {
    %c0 = arith.constant 0 : index
    %c0_0 = arith.constant 0 : index
    %0 = vector.load %arg1[%c0, %c0_0] : memref<8x16xf32, #tpu.memory_space<vmem>>, vector<8x16xf32>
    %1 = arith.truncf %0 : vector<8x16xf32> to vector<8x16xbf16>
    %c0_1 = arith.constant 0 : index
    %c0_2 = arith.constant 0 : index
    %2 = vector.load %arg2[%c0_1, %c0_2] : memref<16x128xbf16, #tpu.memory_space<vmem>>, vector<16x128xbf16>
    %cst = arith.constant dense<0.000000e+00> : vector<8x128xf32>
    %3 = tpu.matmul %1, %2, %cst {dimension_numbers = #tpu.dot_dimension_numbers<[1], [0], [0], [1], [0, 0, 1, 1], [], []>} : vector<8x16xbf16>, vector<16x128xbf16>, vector<8x128xf32> -> vector<8x128xf32>
    %c0_3 = arith.constant 0 : index
    %c0_4 = arith.constant 0 : index
    %4 = vector.load %arg3[%c0_3, %c0_4] : memref<1x128xf32, #tpu.memory_space<vmem>>, vector<1x128xf32>
    %5 = vector.broadcast %4 : vector<1x128xf32> to vector<8x128xf32>
    %6 = arith.addf %3, %5 : vector<8x128xf32>
    %7 = math.tanh %6 : vector<8x128xf32>
    %8 = arith.truncf %7 : vector<8x128xf32> to vector<8x128xbf16>
    %c0_5 = arith.constant 0 : index
    %c0_6 = arith.constant 0 : index
    %9 = vector.load %arg4[%c0_5, %c0_6] : memref<128x128xbf16, #tpu.memory_space<vmem>>, vector<128x128xbf16>
    %cst_7 = arith.constant dense<0.000000e+00> : vector<8x128xf32>
    %10 = tpu.matmul %8, %9, %cst_7 {dimension_numbers = #tpu.dot_dimension_numbers<[1], [0], [0], [1], [0, 0, 1, 1], [], []>} : vector<8x128xbf16>, vector<128x128xbf16>, vector<8x128xf32> -> vector<8x128xf32>
    %c0_8 = arith.constant 0 : index
    %c0_9 = arith.constant 0 : index
    %11 = vector.load %arg5[%c0_8, %c0_9] : memref<1x128xf32, #tpu.memory_space<vmem>>, vector<1x128xf32>
    %12 = vector.broadcast %11 : vector<1x128xf32> to vector<8x128xf32>
    %13 = arith.addf %10, %12 : vector<8x128xf32>
    %14 = math.tanh %13 : vector<8x128xf32>
    %15 = arith.truncf %14 : vector<8x128xf32> to vector<8x128xbf16>
    %c0_10 = arith.constant 0 : index
    %c0_11 = arith.constant 0 : index
    %16 = vector.load %arg6[%c0_10, %c0_11] : memref<128x128xbf16, #tpu.memory_space<vmem>>, vector<128x128xbf16>
    %cst_12 = arith.constant dense<0.000000e+00> : vector<8x128xf32>
    %17 = tpu.matmul %15, %16, %cst_12 {dimension_numbers = #tpu.dot_dimension_numbers<[1], [0], [0], [1], [0, 0, 1, 1], [], []>} : vector<8x128xbf16>, vector<128x128xbf16>, vector<8x128xf32> -> vector<8x128xf32>
    %c0_13 = arith.constant 0 : index
    %c0_14 = arith.constant 0 : index
    %18 = vector.load %arg7[%c0_13, %c0_14] : memref<1x128xf32, #tpu.memory_space<vmem>>, vector<1x128xf32>
    %19 = vector.broadcast %18 : vector<1x128xf32> to vector<8x128xf32>
    %20 = arith.addf %17, %19 : vector<8x128xf32>
    %21 = tpu.iota {dimensions = array<i32: 1>} : vector<8x128xi32>
    %c4_i32 = arith.constant 4 : i32
    %22 = vector.broadcast %c4_i32 : i32 to vector<8x128xi32>
    %23 = arith.cmpi slt, %21, %22 : vector<8x128xi32>
    %c4_i32_15 = arith.constant 4 : i32
    %24 = vector.broadcast %c4_i32_15 : i32 to vector<8x128xi32>
    %25 = arith.cmpi eq, %21, %24 : vector<8x128xi32>
    %cst_16 = arith.constant -1.000000e+30 : f32
    %26 = vector.broadcast %cst_16 : f32 to vector<8x128xf32>
    %27 = arith.select %23, %20, %26 : vector<8x128xi1>, vector<8x128xf32>
    %cst_17 = arith.constant dense<0xFF800000> : vector<8xf32>
    %28 = vector.multi_reduction <maximumf>, %27, %cst_17 [1] : vector<8x128xf32> to vector<8xf32>
    %29 = vector.shape_cast %28 : vector<8xf32> to vector<8x1xf32>
    %30 = vector.broadcast %29 : vector<8x1xf32> to vector<8x128xf32>
    %31 = arith.subf %27, %30 : vector<8x128xf32>
    %32 = math.exp %31 : vector<8x128xf32>
    %cst_18 = arith.constant dense<0.000000e+00> : vector<8xf32>
    %33 = vector.multi_reduction <add>, %32, %cst_18 [1] : vector<8x128xf32> to vector<8xf32>
    %34 = vector.shape_cast %33 : vector<8xf32> to vector<8x1xf32>
    %35 = tpu.reciprocal %34 {approx = true} : vector<8x1xf32> -> vector<8x1xf32>
    %36 = vector.broadcast %35 : vector<8x1xf32> to vector<8x128xf32>
    %37 = arith.mulf %32, %36 : vector<8x128xf32>
    %38 = arith.select %25, %20, %37 : vector<8x128xi1>, vector<8x128xf32>
    %c0_19 = arith.constant 0 : index
    %c0_20 = arith.constant 0 : index
    %39 = vector.load %arg8[%c0_19, %c0_20] : memref<8x128xf32, #tpu.memory_space<vmem>>, vector<8x128xf32>
    tpu.vector_store %arg8[%c0_19, %c0_20], %38 {strides = array<i32>} : memref<8x128xf32, #tpu.memory_space<vmem>>, vector<8x128xf32>,
    return
  }
  func.func @transform_0(%arg0: i32) -> (i32, i32) {
    %c0_i32 = arith.constant 0 : i32
    %c0_i32_0 = arith.constant 0 : i32
    return %arg0, %c0_i32 : i32, i32
  }
  func.func @transform_1(%arg0: i32) -> (i32, i32) {
    %c0_i32 = arith.constant 0 : i32
    %c0_i32_0 = arith.constant 0 : i32
    %c0_i32_1 = arith.constant 0 : i32
    return %c0_i32, %c0_i32_0 : i32, i32
  }
  func.func @transform_2(%arg0: i32) -> (i32, i32) {
    %c0_i32 = arith.constant 0 : i32
    %c0_i32_0 = arith.constant 0 : i32
    %c0_i32_1 = arith.constant 0 : i32
    return %c0_i32, %c0_i32_0 : i32, i32
  }
  func.func @transform_3(%arg0: i32) -> (i32, i32) {
    %c0_i32 = arith.constant 0 : i32
    %c0_i32_0 = arith.constant 0 : i32
    %c0_i32_1 = arith.constant 0 : i32
    return %c0_i32, %c0_i32_0 : i32, i32
  }
  func.func @transform_4(%arg0: i32) -> (i32, i32) {
    %c0_i32 = arith.constant 0 : i32
    %c0_i32_0 = arith.constant 0 : i32
    %c0_i32_1 = arith.constant 0 : i32
    return %c0_i32, %c0_i32_0 : i32, i32
  }
  func.func @transform_5(%arg0: i32) -> (i32, i32) {
    %c0_i32 = arith.constant 0 : i32
    %c0_i32_0 = arith.constant 0 : i32
    %c0_i32_1 = arith.constant 0 : i32
    return %c0_i32, %c0_i32_0 : i32, i32
  }
  func.func @transform_6(%arg0: i32) -> (i32, i32) {
    %c0_i32 = arith.constant 0 : i32
    %c0_i32_0 = arith.constant 0 : i32
    %c0_i32_1 = arith.constant 0 : i32
    return %c0_i32, %c0_i32_0 : i32, i32
  }
  func.func @transform_7(%arg0: i32) -> (i32, i32) {
    %c0_i32 = arith.constant 0 : i32
    %c0_i32_0 = arith.constant 0 : i32
    return %arg0, %c0_i32 : i32, i32
  }
}

</mosaic_0001>

<bundles_post_ra>
// kernel: actor_critic_forward.1
= control target key start
LH: loop header
LB: loop body
LE: loop exit
PB: predicated region body
PF: predicated region fallthrough
CT: control target
= control target key end

     0   :  { %12 = vsyncpa [#allocation3], 0  ;;  %s619_s0 = inlined_call_operand.vmem [shape: f32[8,16], index: 0, kind: input, shape index: {}]   ;;  %s620_s1 = inlined_call_operand.vmem [shape: bf16[16,128], index: 1, kind: input, shape index: {}]   ;;  %s621_s2 = inlined_call_operand.vmem [shape: f32[1,128], index: 2, kind: input, shape index: {}]   ;;  %s622_s3 = inlined_call_operand.hbm [shape: bf16[128,128], index: 3, kind: input, shape index: {}]   ;;  %s623_s4 = inlined_call_operand.vmem [shape: f32[1,128], index: 4, kind: input, shape index: {}]   ;;  %s624_s5 = inlined_call_operand.hbm [shape: bf16[128,128], index: 5, kind: input, shape index: {}]   ;;  %s625_s6 = inlined_call_operand.vmem [shape: f32[1,128], index: 6, kind: input, shape index: {}]   ;;  %s626_s7 = inlined_call_operand.vmem [shape: f32[8,128], index: 7, kind: output, shape index: {}]  }
   0x1   :  { %13 = vsyncpa [#allocation5], 0  ;;  %s526_s24 = smov [#allocation2]  }
   0x2   :  { %s25_s25 = sshll.u32 %s526_s24, 4  ;;  %s26_s25 = int_to_ptr.vmem [resolvable:$true] %s25_s25 }
   0x3   :  { %s490_s26 = scalar_lea.vmem %s26_s25, 1024  ;;  %p495_p1 = scmp.lt.s32.totalorder %s26_s25, %s26_s25 }
   0x4   :  { %p491_p0 = scmp.ne.s32.totalorder %s26_s25, %s490_s26  ;;  %p496_p2 = scmp.lt.s32.totalorder %s490_s26, %s490_s26 }
   0x6   :  { %p497_p3 = por %p496_p2, %p495_p1 }
   0x8   :  { %p498_p4 = pnand %p497_p3, %p491_p0 }
   0xa   :  { %501 = shalt.err (!%p498_p4)
}
   0xb   :  { %s527_s27 = smov 64   ;;  %s528_s28 = smov 4  }
   0xc   :  { %31 = dma.hbm_to_vmem [thread:$0]  %s622_s3, 1024, %s26_s25, [#allocation3], %s527_s27, %s527_s27, %s528_s28  }
   0xd   :  { %s529_s8 = smov [#allocation4]  }
   0xe   :  { %s39_s9 = sshll.u32 %s529_s8, 4  ;;  %s40_s9 = int_to_ptr.vmem [resolvable:$true] %s39_s9 }
   0xf   :  { %s510_s10 = scalar_lea.vmem %s40_s9, 1024  ;;  %p515_p6 = scmp.lt.s32.totalorder %s40_s9, %s40_s9 }
  0x10   :  { %p511_p5 = scmp.ne.s32.totalorder %s40_s9, %s510_s10  ;;  %p516_p7 = scmp.lt.s32.totalorder %s510_s10, %s510_s10 }
  0x12   :  { %p517_p8 = por %p516_p7, %p515_p6 }
  0x14   :  { %p518_p9 = pnand %p517_p8, %p511_p5 }
  0x16   :  { %521 = shalt.err (!%p518_p9)
}
  0x17   :  { %45 = dma.hbm_to_vmem [thread:$0]  %s624_s5, 1024, %s40_s9, [#allocation5], %s527_s27, %s527_s27, %s528_s28  }
  0x18   :  { %522 = dma.done.wait [#allocation3], 1024  }
  0x19   :  { %523 = vsyncadd [#allocation3], 4294966272 }
  0x1a   :  { %524 = dma.done.wait [#allocation5], 1024  }
  0x1b   :  { %525 = vsyncadd [#allocation5], 4294966272  ;;  %v530_v0 = vmov 0.0   ;;  %vm531_vm0 = vmmov 0   ;;  %v457_v1 = vld [vmem:[%s620_s1] sm:$0xff]   ;;  %vm72_vm1 = vcmask 130048   ;;  %v342_v36 = vlaneseq }
  0x1c   :  { %405 = vmatprep.subr.bf16.mxu0 %v530_v0  ;;  %407 = vmatprep.mubr.msk.bf16.mxu0 %vm531_vm0, %v530_v0  ;;  %v55_v2 = vld [vmem:[%s619_s0] sm:$0xff]  ;;  %v458_v4 = vld [vmem:[#allocation2 + $0x38] sm:$0xff]   ;;  %v459_v5 = vld [vmem:[#allocation2 + $0x30] sm:$0xff]  }
  0x1d   :  { %411 = vmatprep.subr.bf16.mxu1 %v530_v0  ;;  %427 = vmatprep.mubr.msk.bf16.mxu1 %vm531_vm0, %v530_v0  ;;  %v56_v3 = vpack.c.bf16 %v55_v2, %v55_v2  ;;  %v460_v6 = vld [vmem:[#allocation2 + $0x28] sm:$0xff]   ;;  %v461_v7 = vld [vmem:[#allocation2 + $0x20] sm:$0xff]   ;;  %v462_v8 = vld [vmem:[#allocation2 + $0x18] sm:$0xff]   ;;  %v343_v37 = vand.u32 127, %v342_v36 }
  0x1e   :  { %406 = vmatpush3.bf16.msra.mxu0 %v457_v1  ;;  %412 = vmatpush3.bf16.msra.mxu1 %v458_v4  ;;  %v463_v9 = vld [vmem:[#allocation2 + $0x10] sm:$0xff]   ;;  %v464_v10 = vld [vmem:[#allocation2 + $0x8] sm:$0xff]   ;;  %v465_v11 = vld [vmem:[#allocation2] sm:$0xff]  }
  0x1f   :  { %431 = vmatprep.subr.bf16.mxu0 %v530_v0  ;;  %413 = vmatprep.subr.bf16.mxu1 %v530_v0  ;;  %v466_v12 = vld [vmem:[#allocation4 + $0x38] sm:$0xff]   ;;  %v467_v13 = vld [vmem:[#allocation4 + $0x30] sm:$0xff]   ;;  %v468_v14 = vld [vmem:[#allocation4 + $0x28] sm:$0xff]   ;;  %vm344_vm2 = vcmp.lt.s32.totalorder %v343_v37, 4  ;;  %vm345_vm3 = vcmp.eq.s32.totalorder %v343_v37, 4 }
  0x20   :  { %v364_v15 = vld [vmem:[%s621_s2] ss:$0 sm:$0xff]  ;;  %v470_v24 = vld [vmem:[#allocation4 + $0x18] sm:$0xff]   ;;  %v471_v25 = vld [vmem:[#allocation4 + $0x10] sm:$0xff]  }
  0x21   :  { %408 = vmatmul.mubr.msk.bf16.vlgmr.msra.gmra.mxu0 %vm72_vm1, %v56_v3  ;;  %v469_v23 = vld [vmem:[#allocation4 + $0x20] sm:$0xff]   ;;  %v472_v26 = vld [vmem:[#allocation4 + $0x8] sm:$0xff]  }
  0x22   :  { %447 = vmatprep.mubr.msk.bf16.mxu0 %vm531_vm0, %v530_v0  ;;  %414 = vmatpush3.bf16.msra.mxu1 %v459_v5  ;;  %v473_v27 = vld [vmem:[#allocation4] sm:$0xff]  }
  0x23   :  { %415 = vmatprep.subr.bf16.mxu1 %v530_v0  ;;  %432 = vmatpush3.bf16.msra.mxu0 %v466_v12  ;;  %v367_v28 = vld [vmem:[%s623_s4] ss:$0 sm:$0xff] }
  0x24   :  { %433 = vmatprep.subr.bf16.mxu0 %v530_v0  ;;  %v376_v38 = vld [vmem:[%s625_s6] ss:$0 sm:$0xff] }
  0x26   :  { %416 = vmatpush3.bf16.msra.mxu1 %v460_v6 }
  0x27   :  { %417 = vmatprep.subr.bf16.mxu1 %v530_v0  ;;  %434 = vmatpush3.bf16.msra.mxu0 %v467_v13 }
  0x28   :  { %435 = vmatprep.subr.bf16.mxu0 %v530_v0 }
  0x2a   :  { %418 = vmatpush3.bf16.msra.mxu1 %v461_v7 }
  0x2b   :  { %419 = vmatprep.subr.bf16.mxu1 %v530_v0  ;;  %436 = vmatpush3.bf16.msra.mxu0 %v468_v14 }
  0x2c   :  { %437 = vmatprep.subr.bf16.mxu0 %v530_v0 }
  0x2e   :  { %420 = vmatpush3.bf16.msra.mxu1 %v462_v8 }
  0x2f   :  { %421 = vmatprep.subr.bf16.mxu1 %v530_v0  ;;  %438 = vmatpush3.bf16.msra.mxu0 %v469_v23 }
  0x30   :  { %439 = vmatprep.subr.bf16.mxu0 %v530_v0 }
  0x32   :  { %422 = vmatpush3.bf16.msra.mxu1 %v463_v9 }
  0x33   :  { %423 = vmatprep.subr.bf16.mxu1 %v530_v0  ;;  %440 = vmatpush3.bf16.msra.mxu0 %v470_v24 }
  0x34   :  { %441 = vmatprep.subr.bf16.mxu0 %v530_v0 }
  0x36   :  { %424 = vmatpush3.bf16.msra.mxu1 %v464_v10 }
  0x37   :  { %425 = vmatprep.subr.bf16.mxu1 %v530_v0  ;;  %442 = vmatpush3.bf16.msra.mxu0 %v471_v25 }
  0x38   :  { %443 = vmatprep.subr.bf16.mxu0 %v530_v0 }
  0x3a   :  { %426 = vmatpush3.bf16.msra.mxu1 %v465_v11 }
  0x3b   :  { %444 = vmatpush3.bf16.msra.mxu0 %v472_v26 }
  0x3c   :  { %445 = vmatprep.subr.bf16.mxu0 %v530_v0 }
  0x3f   :  { %446 = vmatpush3.bf16.msra.mxu0 %v473_v27 }
  0xe1   :  { %v110_v16 = vpop.f32.mrf.mxu0 }
  0xe2   :  { %v111_v17 = vadd.f32 %v364_v15, %v110_v16 }
  0xe3   :  { %v409_v18 = vpop.f32.mrf.mxu0 }
  0xe4   :  { %474 = vtanh.f32 %v111_v17 }
  0xe5   :  { %v113_v19 = vpop.f32.mrf.mxu0 }
  0xe7   :  { %v410_v20 = vpop.f32.mrf.mxu0 }
  0xf1   :  { %v475_v21 = vpop.eup %474 }
  0xf2   :  { %v117_v22 = vpack.c.bf16 %v475_v21, %v475_v21 }
  0xf4   :  { %428 = vmatmul.mubr.bf16.vlgmr.msra.gmra.mxu1 %v117_v22 }
 0x1b4   :  { %v223_v29 = vpop.f32.mrf.mxu1 }
 0x1b5   :  { %v224_v30 = vadd.f32 %v367_v28, %v223_v29 }
 0x1b6   :  { %v429_v31 = vpop.f32.mrf.mxu1 }
 0x1b7   :  { %476 = vtanh.f32 %v224_v30 }
 0x1b8   :  { %v226_v32 = vpop.f32.mrf.mxu1 }
 0x1ba   :  { %v430_v33 = vpop.f32.mrf.mxu1 }
 0x1c4   :  { %v477_v34 = vpop.eup %476 }
 0x1c5   :  { %v230_v35 = vpack.c.bf16 %v477_v34, %v477_v34 }
 0x1c7   :  { %448 = vmatmul.mubr.bf16.vlgmr.msra.gmra.mxu0 %v230_v35 }
 0x287   :  { %v336_v39 = vpop.f32.mrf.mxu0 }
 0x288   :  { %v337_v40 = vadd.f32 %v376_v38, %v336_v39 }
 0x289   :  { %v449_v41 = vpop.f32.mrf.mxu0 }
 0x28a   :  { %v346_v42 = vsel %vm344_vm2, %v337_v40, -1e+30 }
 0x28b   :  { %347 = vmax.xlane.f32.xlu0 %v346_v42  ;;  %v339_v43 = vpop.f32.mrf.mxu0 }
 0x28d   :  { %v450_v44 = vpop.f32.mrf.mxu0 }
 0x314   :  { %v348_v45 = vpop.xlane.xlu0 %347 }
 0x315   :  { %v349_v46 = vsub.f32 %v346_v42, %v348_v45 }
 0x317   :  { %v350_v47 = vmul.f32 1.442695, %v349_v46 }
 0x319   :  { %478 = vpow2.f32 %v350_v47 }
 0x326   :  { %v479_v48 = vpop.eup %478 }
 0x327   :  { %352 = vadd.xlane.f32.xlu0 %v479_v48 }
 0x3b0   :  { %v353_v49 = vpop.xlane.xlu0 %352 }
 0x3b1   :  { %480 = vrcp.f32 %v353_v49 }
 0x3be   :  { %v481_v50 = vpop.eup %480 }
 0x3bf   :  { %v355_v51 = vmul.f32 %v481_v50, %v479_v48 }
 0x3c1   :  { %v356_v52 = vsel %vm345_vm3, %v337_v40, %v355_v51 }
 0x3c2   :  { %357 = vst [vmem:[%s626_s7] sm:$0xff] %v356_v52 }
 0x3c3   :  { %362 = vsyncpa [#allocation3], 1 }
 0x3c4   :  { %363 = vsyncpa [#allocation5], 1 }

</bundles_post_ra>
